<compile_context>
chip_gen: v7x
topology: tpu7x:2x2x1
jax: 0.10.0
libtpu: 0.0.40
codegen_flags: <defaults>
</compile_context>

<pallas_src>
import math
import functools

import jax
import jax.numpy as jnp
from jax import lax
from jax.experimental import pallas as pl
from jax.experimental.pallas import tpu as pltpu

_SUB = 8  # time rows per sub-block == f32 sublane count of one vreg tile


def _mega_ema_kernel(x_ref, tmat_ref, ac_ref, bc_ref, qs_ref, omega_ref,
                     out_ref, h_ref, *, ndim, t_chunk):
    # x_ref / out_ref : (t_chunk, d_tile)   — time on sublanes, fused batch*channels on lanes
    # tmat_ref        : (S*S, d_tile)       — row l*S+s = taps[s-l] (0 for s<l), causal FIR bank
    # ac_ref          : (N*S, d_tile)       — row n*S+s = gamma*scale * q^(s+1)   (carry proj)
    # bc_ref          : (N*S, d_tile)       — row n*S+l = p*beta * q^(S-1-l)      (state update)
    # qs_ref          : (N, d_tile)         — q^S                                  (state decay)
    # omega_ref       : (1, d_tile)
    # h_ref           : (N, d_tile) f32 EMA state, carried across time chunks (grid axis 1).
    S = _SUB
    n_sub = t_chunk // S

    # Carried state is only correct because grid axis 1 (time chunks) is innermost and
    # marked "arbitrary". Reset at the start of every (batch*channel-tile) column block.
    @pl.when(pl.program_id(1) == 0)
    def _():
        h_ref[...] = jnp.zeros_like(h_ref)

    # Hoisted per-chunk coefficient loads (small, lane-dense, already f32).
    tmat = tmat_ref[...]
    ac = ac_ref[...]
    bc = bc_ref[...]
    qs = qs_ref[...]
    omega = omega_ref[...]

    h0 = h_ref[...]
    h_init = tuple(h0[n:n + 1, :] for n in range(ndim))   # keep state rows in vregs

    def body(sb, h):
        off = pl.multiple_of(sb * S, S)
        x_blk = x_ref[pl.ds(off, S), :].astype(jnp.float32)          # dense (S, d_tile) load

        # Intra-block causal FIR: acc[s] = sum_{l<=s} taps[s-l] * x[l]
        acc = tmat[0:S, :] * x_blk[0:1, :]
        for l in range(1, S):
            acc = acc + tmat[l * S:(l + 1) * S, :] * x_blk[l:l + 1, :]
        # Cross-block carry: + sum_n gamma*scale * q^(s+1) * h_prev[n]
        for n in range(ndim):
            acc = acc + ac[n * S:(n + 1) * S, :] * h[n]

        # Fused residual + SiLU; one dense unmasked (S, d_tile) store per sub-block.
        y = acc + omega * x_blk
        out_ref[pl.ds(off, S), :] = (y * jax.nn.sigmoid(y)).astype(out_ref.dtype)

        # State update once per sub-block: h <- q^S * h + sum_l q^(S-1-l) * p*beta * x[l]
        new_h = []
        for n in range(ndim):
            upd = jnp.sum(bc[n * S:(n + 1) * S, :] * x_blk, axis=0, keepdims=True)
            new_h.append(qs[n:n + 1, :] * h[n] + upd)
        return tuple(new_h)

    h_fin = lax.fori_loop(0, n_sub, body, h_init)
    for n in range(ndim):
        h_ref[n:n + 1, :] = h_fin[n]


def _choose_tile(dim, preferred):
    for t in preferred:
        if dim % t == 0:
            return t
    return None


def multi_head_ema_forward(x, delta, alpha, beta, gamma, omega, *, ndim,
                           d_tile=None, t_chunk=None):
    """x: (L, B, D) (Time x Batch x Channel, as in PyTorch).

    Params in PyTorch layout: delta/alpha/beta (D, N, 1), gamma (D, N), omega (D,).
    """
    L, B, D = x.shape
    N = ndim
    S = _SUB
    f32 = jnp.float32

    assert D % 128 == 0, (
        "embed_dim must be a multiple of 128 for lane tiling; pad channels upstream")

    if d_tile is None:
        d_tile = _choose_tile(D, (256, 512, 128))
    assert d_tile is not None and D % d_tile == 0 and d_tile % 128 == 0, \
        f"d_tile={d_tile} must divide D={D} and be a multiple of 128"

    if t_chunk is None:
        t_chunk = 512 if L >= 512 else S * ((L + S - 1) // S)
    assert t_chunk % S == 0, f"t_chunk={t_chunk} must be a multiple of {S}"

    # Pad time (end of sequence) to a multiple of t_chunk; EMA is causal so trailing
    # zero-padding never affects the first L outputs.
    L_pad = ((L + t_chunk - 1) // t_chunk) * t_chunk

    # ---- Precompute all EMA coefficients once in the wrapper (f32) ----
    scale = math.sqrt(1.0 / N)
    p = jax.nn.sigmoid(delta.reshape(D, N).astype(f32))      # (D, N)
    a = jax.nn.sigmoid(alpha.reshape(D, N).astype(f32))      # (D, N)
    q = 1.0 - p * a                                          # (D, N), in (0, 1)
    pb = p * beta.reshape(D, N).astype(f32)                  # (D, N)
    gs = gamma.astype(f32) * scale                           # (D, N)

    j = jnp.arange(S, dtype=f32)
    logq = jnp.log(q)[:, :, None]                            # (D, N, 1)
    qj = jnp.exp(logq * j)                                   # (D, N, S)  q^j
    qj1 = jnp.exp(logq * (j + 1.0))                          # (D, N, S)  q^(j+1)
    qrev = jnp.exp(logq * (S - 1.0 - j))                     # (D, N, S)  q^(S-1-j)
    qS = jnp.exp(logq[..., 0] * float(S))                    # (D, N)     q^S

    taps = jnp.einsum('dnj,dn->jd', qj, gs * pb)             # (S, D) FIR taps
    # Banded causal tap matrix: Tmat[l, s, d] = taps[s-l, d] if s >= l else 0.
    idx_l = jnp.arange(S)[:, None]
    idx_s = jnp.arange(S)[None, :]
    diff = idx_s - idx_l
    valid = diff >= 0
    tmat = jnp.where(valid[:, :, None], taps[jnp.where(valid, diff, 0)], 0.0)
    tmat = tmat.reshape(S * S, D)                            # row l*S + s

    ac = jnp.einsum('dnj,dn->njd', qj1, gs).reshape(N * S, D)    # row n*S + s
    bc = jnp.einsum('dnj,dn->njd', qrev, pb).reshape(N * S, D)   # row n*S + l
    qs = jnp.transpose(qS, (1, 0))                               # (N, D)
    omega_row = omega.reshape(1, D).astype(f32)

    # ---- Layout: (L, B*D), lanes = fused batch*channels (no HBM transpose) ----
    BD = B * D
    x2d = x.reshape(L, BD)
    if L_pad != L:
        x2d = jnp.pad(x2d, ((0, L_pad - L), (0, 0)))

    dpb = D // d_tile                     # channel tiles per batch
    grid = (BD // d_tile, L_pad // t_chunk)

    kernel = functools.partial(_mega_ema_kernel, ndim=N, t_chunk=t_chunk)

    out2d = pl.pallas_call(
        kernel,
        grid=grid,
        out_shape=jax.ShapeDtypeStruct((L_pad, BD), x.dtype),
        in_specs=[
            pl.BlockSpec((t_chunk, d_tile), lambda di, ti: (ti, di)),
            pl.BlockSpec((S * S, d_tile), lambda di, ti: (0, di % dpb)),
            pl.BlockSpec((N * S, d_tile), lambda di, ti: (0, di % dpb)),
            pl.BlockSpec((N * S, d_tile), lambda di, ti: (0, di % dpb)),
            pl.BlockSpec((N, d_tile), lambda di, ti: (0, di % dpb)),
            pl.BlockSpec((1, d_tile), lambda di, ti: (0, di % dpb)),
        ],
        out_specs=pl.BlockSpec((t_chunk, d_tile), lambda di, ti: (ti, di)),
        scratch_shapes=[pltpu.VMEM((N, d_tile), jnp.float32)],   # carried EMA state
        compiler_params=pltpu.CompilerParams(
            # Axis 1 (time chunks) carries the VMEM state: it MUST stay innermost and
            # "arbitrary". Axis 0 (fused batch*channel tiles) is megacore-shardable.
            dimension_semantics=("parallel", "arbitrary"),
            vmem_limit_bytes=32 * 1024 * 1024),
    )(x2d, tmat, ac, bc, qs, omega_row)

    return out2d[:L].reshape(L, B, D)


def ref_forward(x, delta, alpha, beta, gamma, omega, *, ndim):
    """Pure-JAX reference mirroring the PyTorch FFT-conv forward path."""
    L, B, D = x.shape
    scale = math.sqrt(1.0 / ndim)
    p = jax.nn.sigmoid(delta)                                  # (D, N, 1)
    a = jax.nn.sigmoid(alpha)                                  # (D, N, 1)
    q = 1.0 - p * a                                            # (D, N, 1)
    t = jnp.arange(L, dtype=jnp.float32).reshape(1, 1, L)
    vander = t * jnp.log(q)                                    # (D, N, L)
    kern = (p * beta) * jnp.exp(vander)                        # (D, N, L)
    k = jnp.einsum('dnl,dn->dl', kern, gamma * scale)          # (D, L)
    x_bdl = jnp.transpose(x, (1, 2, 0))                        # (B, D, L)
    k_f = jnp.fft.rfft(k.astype(jnp.float32), n=2 * L)
    x_f = jnp.fft.rfft(x_bdl.astype(jnp.float32), n=2 * L)
    out = jnp.fft.irfft(x_f * k_f, n=2 * L)[..., :L]           # (B, D, L)
    residual = x * omega[None, None, :]
    y = jnp.transpose(out, (2, 0, 1)).astype(x.dtype) + residual
    return y * jax.nn.sigmoid(y)


if __name__ == "__main__":
    # Small shapes consistent with the module: (seq_len, batch, embed_dim), ndim=2.
    # Chosen so the test exercises batch, D-tiling, multiple sub-blocks per chunk and
    # cross-chunk state carry.
    L, B, D, N = 32, 2, 256, 2

    key = jax.random.PRNGKey(0)
    kx, kd, ka, kb, kg, ko = jax.random.split(key, 6)

    x = jax.random.normal(kx, (L, B, D), dtype=jnp.float32)

    # Parameter init matching reset_parameters(), in PyTorch layouts.
    delta = 0.2 * jax.random.normal(kd, (D, N, 1), dtype=jnp.float32)
    alpha = 0.2 * jax.random.normal(ka, (D, N, 1), dtype=jnp.float32)
    val = jnp.where(jnp.arange(N) % 2 == 1, -1.0, 1.0).astype(jnp.float32).reshape(1, N, 1)
    beta = 0.02 * jax.random.normal(kb, (D, N, 1), dtype=jnp.float32) + val
    gamma = jax.random.normal(kg, (D, N), dtype=jnp.float32)
    omega = jax.random.normal(ko, (D,), dtype=jnp.float32)

    # Force small tiles so the grid is (B*D/d_tile=4, T_chunks=2), 2 sub-blocks per chunk.
    out = multi_head_ema_forward(x, delta, alpha, beta, gamma, omega,
                                 ndim=N, d_tile=128, t_chunk=16)
    out = jax.block_until_ready(out)
    ref = jax.block_until_ready(ref_forward(x, delta, alpha, beta, gamma, omega, ndim=N))
    assert out.shape == (L, B, D)
    assert jnp.allclose(out, ref, atol=2e-4, rtol=2e-4), \
        f"max abs err {jnp.max(jnp.abs(out - ref))}"

    # Second check: default tiles + time padding path (L not a multiple of 8).
    L2, B2, D2 = 20, 1, 128
    x2 = jax.random.normal(jax.random.PRNGKey(1), (L2, B2, D2), dtype=jnp.float32)
    out2 = multi_head_ema_forward(x2, delta[:D2], alpha[:D2], beta[:D2],
                                  gamma[:D2], omega[:D2], ndim=N)
    out2 = jax.block_until_ready(out2)
    ref2 = jax.block_until_ready(ref_forward(x2, delta[:D2], alpha[:D2], beta[:D2],
                                             gamma[:D2], omega[:D2], ndim=N))
    assert out2.shape == (L2, B2, D2)
    assert jnp.allclose(out2, ref2, atol=2e-4, rtol=2e-4), \
        f"max abs err {jnp.max(jnp.abs(out2 - ref2))}"

    print("KERNEL_OK")
</pallas_src>

<mosaic_0001>
module attributes {stable_mosaic.version = 11 : i64} {
  func.func @_mega_ema_kernel(%arg0: i32, %arg1: i32, %arg2: memref<16x128xf32, #tpu.memory_space<vmem>>, %arg3: memref<64x128xf32, #tpu.memory_space<vmem>>, %arg4: memref<16x128xf32, #tpu.memory_space<vmem>>, %arg5: memref<16x128xf32, #tpu.memory_space<vmem>>, %arg6: memref<2x128xf32, #tpu.memory_space<vmem>>, %arg7: memref<1x128xf32, #tpu.memory_space<vmem>>, %arg8: memref<16x128xf32, #tpu.memory_space<vmem>>, %arg9: memref<2x128xf32, #tpu.memory_space<vmem>>) attributes {dimension_semantics = [#tpu.dimension_semantics<parallel>, #tpu.dimension_semantics<arbitrary>], iteration_bounds = array<i64: 4, 2>, scalar_prefetch = 0 : i64, scratch_operands = 1 : i64, tpu.core_type = #tpu.core_type<tc>, window_params = [{transform_indices = @transform_0, window_bounds = array<i64: 16, 128>}, {transform_indices = @transform_1, window_bounds = array<i64: 64, 128>}, {transform_indices = @transform_2, window_bounds = array<i64: 16, 128>}, {transform_indices = @transform_3, window_bounds = array<i64: 16, 128>}, {transform_indices = @transform_4, window_bounds = array<i64: 2, 128>}, {transform_indices = @transform_5, window_bounds = array<i64: 1, 128>}, {transform_indices = @transform_6, window_bounds = array<i64: 16, 128>}]} {
    %c0_i32 = arith.constant 0 : i32
    %0 = arith.cmpi eq, %arg1, %c0_i32 : i32
    %1 = arith.extui %0 : i1 to i32
    %c0_i32_0 = arith.constant 0 : i32
    %2 = arith.cmpi ne, %1, %c0_i32_0 : i32
    scf.if %2 {
      %cst = arith.constant 0.000000e+00 : f32
      %15 = vector.broadcast %cst : f32 to vector<2x128xf32>
      %c0_17 = arith.constant 0 : index
      %c0_18 = arith.constant 0 : index
      %16 = vector.load %arg9[%c0_17, %c0_18] : memref<2x128xf32, #tpu.memory_space<vmem>>, vector<2x128xf32>
      tpu.vector_store %arg9[%c0_17, %c0_18], %15 {strides = array<i32>} : memref<2x128xf32, #tpu.memory_space<vmem>>, vector<2x128xf32>,
    } else {
    }
    %c0 = arith.constant 0 : index
    %c0_1 = arith.constant 0 : index
    %3 = vector.load %arg3[%c0, %c0_1] : memref<64x128xf32, #tpu.memory_space<vmem>>, vector<64x128xf32>
    %c0_2 = arith.constant 0 : index
    %c0_3 = arith.constant 0 : index
    %4 = vector.load %arg4[%c0_2, %c0_3] : memref<16x128xf32, #tpu.memory_space<vmem>>, vector<16x128xf32>
    %c0_4 = arith.constant 0 : index
    %c0_5 = arith.constant 0 : index
    %5 = vector.load %arg5[%c0_4, %c0_5] : memref<16x128xf32, #tpu.memory_space<vmem>>, vector<16x128xf32>
    %c0_6 = arith.constant 0 : index
    %c0_7 = arith.constant 0 : index
    %6 = vector.load %arg6[%c0_6, %c0_7] : memref<2x128xf32, #tpu.memory_space<vmem>>, vector<2x128xf32>
    %c0_8 = arith.constant 0 : index
    %c0_9 = arith.constant 0 : index
    %7 = vector.load %arg7[%c0_8, %c0_9] : memref<1x128xf32, #tpu.memory_space<vmem>>, vector<1x128xf32>
    %c0_10 = arith.constant 0 : index
    %c0_11 = arith.constant 0 : index
    %8 = vector.load %arg9[%c0_10, %c0_11] : memref<2x128xf32, #tpu.memory_space<vmem>>, vector<2x128xf32>
    %9 = vector.extract_strided_slice %8 {offsets = [0, 0], sizes = [1, 128], strides = [1, 1]} : vector<2x128xf32> to vector<1x128xf32>
    %10 = vector.extract_strided_slice %8 {offsets = [1, 0], sizes = [1, 128], strides = [1, 1]} : vector<2x128xf32> to vector<1x128xf32>
    %c0_i32_12 = arith.constant 0 : i32
    %c2_i32 = arith.constant 2 : i32
    %11 = arith.addi %c0_i32_12, %c2_i32 : i32
    %c1_i32 = arith.constant 1 : i32
    %12:2 = scf.for %arg10 = %c0_i32_12 to %11 step %c1_i32 iter_args(%arg11 = %9, %arg12 = %10) -> (vector<1x128xf32>, vector<1x128xf32>)  : i32 {
      %c8_i32 = arith.constant 8 : i32
      %15 = arith.muli %arg10, %c8_i32 : i32
      %16 = tpu.assume_multiple %15, 8 : i32
      %17 = arith.index_cast %16 : i32 to index
      %c0_17 = arith.constant 0 : index
      %18 = vector.load %arg2[%17, %c0_17] : memref<16x128xf32, #tpu.memory_space<vmem>>, vector<8x128xf32>
      %19 = vector.extract_strided_slice %3 {offsets = [0, 0], sizes = [8, 128], strides = [1, 1]} : vector<64x128xf32> to vector<8x128xf32>
      %20 = vector.extract_strided_slice %18 {offsets = [0, 0], sizes = [1, 128], strides = [1, 1]} : vector<8x128xf32> to vector<1x128xf32>
      %21 = vector.broadcast %20 : vector<1x128xf32> to vector<8x128xf32>
      %22 = arith.mulf %19, %21 : vector<8x128xf32>
      %23 = vector.extract_strided_slice %3 {offsets = [8, 0], sizes = [8, 128], strides = [1, 1]} : vector<64x128xf32> to vector<8x128xf32>
      %24 = vector.extract_strided_slice %18 {offsets = [1, 0], sizes = [1, 128], strides = [1, 1]} : vector<8x128xf32> to vector<1x128xf32>
      %25 = vector.broadcast %24 : vector<1x128xf32> to vector<8x128xf32>
      %26 = arith.mulf %23, %25 : vector<8x128xf32>
      %27 = arith.addf %22, %26 : vector<8x128xf32>
      %28 = vector.extract_strided_slice %3 {offsets = [16, 0], sizes = [8, 128], strides = [1, 1]} : vector<64x128xf32> to vector<8x128xf32>
      %29 = vector.extract_strided_slice %18 {offsets = [2, 0], sizes = [1, 128], strides = [1, 1]} : vector<8x128xf32> to vector<1x128xf32>
      %30 = vector.broadcast %29 : vector<1x128xf32> to vector<8x128xf32>
      %31 = arith.mulf %28, %30 : vector<8x128xf32>
      %32 = arith.addf %27, %31 : vector<8x128xf32>
      %33 = vector.extract_strided_slice %3 {offsets = [24, 0], sizes = [8, 128], strides = [1, 1]} : vector<64x128xf32> to vector<8x128xf32>
      %34 = vector.extract_strided_slice %18 {offsets = [3, 0], sizes = [1, 128], strides = [1, 1]} : vector<8x128xf32> to vector<1x128xf32>
      %35 = vector.broadcast %34 : vector<1x128xf32> to vector<8x128xf32>
      %36 = arith.mulf %33, %35 : vector<8x128xf32>
      %37 = arith.addf %32, %36 : vector<8x128xf32>
      %38 = vector.extract_strided_slice %3 {offsets = [32, 0], sizes = [8, 128], strides = [1, 1]} : vector<64x128xf32> to vector<8x128xf32>
      %39 = vector.extract_strided_slice %18 {offsets = [4, 0], sizes = [1, 128], strides = [1, 1]} : vector<8x128xf32> to vector<1x128xf32>
      %40 = vector.broadcast %39 : vector<1x128xf32> to vector<8x128xf32>
      %41 = arith.mulf %38, %40 : vector<8x128xf32>
      %42 = arith.addf %37, %41 : vector<8x128xf32>
      %43 = vector.extract_strided_slice %3 {offsets = [40, 0], sizes = [8, 128], strides = [1, 1]} : vector<64x128xf32> to vector<8x128xf32>
      %44 = vector.extract_strided_slice %18 {offsets = [5, 0], sizes = [1, 128], strides = [1, 1]} : vector<8x128xf32> to vector<1x128xf32>
      %45 = vector.broadcast %44 : vector<1x128xf32> to vector<8x128xf32>
      %46 = arith.mulf %43, %45 : vector<8x128xf32>
      %47 = arith.addf %42, %46 : vector<8x128xf32>
      %48 = vector.extract_strided_slice %3 {offsets = [48, 0], sizes = [8, 128], strides = [1, 1]} : vector<64x128xf32> to vector<8x128xf32>
      %49 = vector.extract_strided_slice %18 {offsets = [6, 0], sizes = [1, 128], strides = [1, 1]} : vector<8x128xf32> to vector<1x128xf32>
      %50 = vector.broadcast %49 : vector<1x128xf32> to vector<8x128xf32>
      %51 = arith.mulf %48, %50 : vector<8x128xf32>
      %52 = arith.addf %47, %51 : vector<8x128xf32>
      %53 = vector.extract_strided_slice %3 {offsets = [56, 0], sizes = [8, 128], strides = [1, 1]} : vector<64x128xf32> to vector<8x128xf32>
      %54 = vector.extract_strided_slice %18 {offsets = [7, 0], sizes = [1, 128], strides = [1, 1]} : vector<8x128xf32> to vector<1x128xf32>
      %55 = vector.broadcast %54 : vector<1x128xf32> to vector<8x128xf32>
      %56 = arith.mulf %53, %55 : vector<8x128xf32>
      %57 = arith.addf %52, %56 : vector<8x128xf32>
      %58 = vector.extract_strided_slice %4 {offsets = [0, 0], sizes = [8, 128], strides = [1, 1]} : vector<16x128xf32> to vector<8x128xf32>
      %59 = vector.broadcast %arg11 : vector<1x128xf32> to vector<8x128xf32>
      %60 = arith.mulf %58, %59 : vector<8x128xf32>
      %61 = arith.addf %57, %60 : vector<8x128xf32>
      %62 = vector.extract_strided_slice %4 {offsets = [8, 0], sizes = [8, 128], strides = [1, 1]} : vector<16x128xf32> to vector<8x128xf32>
      %63 = vector.broadcast %arg12 : vector<1x128xf32> to vector<8x128xf32>
      %64 = arith.mulf %62, %63 : vector<8x128xf32>
      %65 = arith.addf %61, %64 : vector<8x128xf32>
      %66 = vector.broadcast %7 : vector<1x128xf32> to vector<8x128xf32>
      %67 = arith.mulf %66, %18 : vector<8x128xf32>
      %68 = arith.addf %65, %67 : vector<8x128xf32>
      %69 = arith.negf %68 : vector<8x128xf32>
      %70 = math.exp %69 : vector<8x128xf32>
      %cst = arith.constant 1.000000e+00 : f32
      %71 = vector.broadcast %cst : f32 to vector<8x128xf32>
      %72 = arith.addf %71, %70 : vector<8x128xf32>
      %73 = arith.divf %71, %72 : vector<8x128xf32>
      %74 = arith.mulf %68, %73 : vector<8x128xf32>
      %75 = arith.index_cast %16 : i32 to index
      %c0_18 = arith.constant 0 : index
      %76 = vector.load %arg8[%75, %c0_18] : memref<16x128xf32, #tpu.memory_space<vmem>>, vector<8x128xf32>
      tpu.vector_store %arg8[%75, %c0_18], %74 {strides = array<i32>} : memref<16x128xf32, #tpu.memory_space<vmem>>, vector<8x128xf32>,
      %77 = vector.extract_strided_slice %5 {offsets = [0, 0], sizes = [8, 128], strides = [1, 1]} : vector<16x128xf32> to vector<8x128xf32>
      %78 = arith.mulf %77, %18 : vector<8x128xf32>
      %cst_19 = arith.constant dense<0.000000e+00> : vector<128xf32>
      %79 = vector.multi_reduction <add>, %78, %cst_19 [0] : vector<8x128xf32> to vector<128xf32>
      %80 = vector.shape_cast %79 : vector<128xf32> to vector<1x128xf32>
      %81 = vector.extract_strided_slice %6 {offsets = [0, 0], sizes = [1, 128], strides = [1, 1]} : vector<2x128xf32> to vector<1x128xf32>
      %82 = arith.mulf %81, %arg11 : vector<1x128xf32>
      %83 = arith.addf %82, %80 : vector<1x128xf32>
      %84 = vector.extract_strided_slice %5 {offsets = [8, 0], sizes = [8, 128], strides = [1, 1]} : vector<16x128xf32> to vector<8x128xf32>
      %85 = arith.mulf %84, %18 : vector<8x128xf32>
      %cst_20 = arith.constant dense<0.000000e+00> : vector<128xf32>
      %86 = vector.multi_reduction <add>, %85, %cst_20 [0] : vector<8x128xf32> to vector<128xf32>
      %87 = vector.shape_cast %86 : vector<128xf32> to vector<1x128xf32>
      %88 = vector.extract_strided_slice %6 {offsets = [1, 0], sizes = [1, 128], strides = [1, 1]} : vector<2x128xf32> to vector<1x128xf32>
      %89 = arith.mulf %88, %arg12 : vector<1x128xf32>
      %90 = arith.addf %89, %87 : vector<1x128xf32>
      scf.yield %83, %90 : vector<1x128xf32>, vector<1x128xf32>
    }
    %c2_i32_13 = arith.constant 2 : i32
    %c0_14 = arith.constant 0 : index
    %c0_15 = arith.constant 0 : index
    %13 = vector.load %arg9[%c0_14, %c0_15] : memref<2x128xf32, #tpu.memory_space<vmem>>, vector<1x128xf32>
    tpu.vector_store %arg9[%c0_14, %c0_15], %12#0 {strides = array<i32>} : memref<2x128xf32, #tpu.memory_space<vmem>>, vector<1x128xf32>,
    %c1 = arith.constant 1 : index
    %c0_16 = arith.constant 0 : index
    %14 = vector.load %arg9[%c1, %c0_16] : memref<2x128xf32, #tpu.memory_space<vmem>>, vector<1x128xf32>
    tpu.vector_store %arg9[%c1, %c0_16], %12#1 {strides = array<i32>} : memref<2x128xf32, #tpu.memory_space<vmem>>, vector<1x128xf32>,
    return
  }
  func.func @transform_0(%arg0: i32, %arg1: i32) -> (i32, i32) {
    %c0_i32 = arith.constant 0 : i32
    return %arg1, %arg0 : i32, i32
  }
  func.func @transform_1(%arg0: i32, %arg1: i32) -> (i32, i32) {
    %c2_i32 = arith.constant 2 : i32
    %c0_i32 = arith.constant 0 : i32
    %0 = arith.cmpi eq, %c2_i32, %c0_i32 : i32
    %c1_i32 = arith.constant 1 : i32
    %1 = arith.select %0, %c1_i32, %c2_i32 : i32
    %2 = arith.remsi %arg0, %1 : i32
    %c0_i32_0 = arith.constant 0 : i32
    %3 = arith.cmpi ne, %2, %c0_i32_0 : i32
    %c0_i32_1 = arith.constant 0 : i32
    %4 = arith.cmpi slt, %2, %c0_i32_1 : i32
    %c0_i32_2 = arith.constant 0 : i32
    %5 = arith.cmpi slt, %1, %c0_i32_2 : i32
    %6 = arith.xori %4, %5 : i1
    %7 = arith.andi %6, %3 : i1
    %8 = arith.addi %2, %1 : i32
    %9 = arith.select %7, %8, %2 : i32
    %c0_i32_3 = arith.constant 0 : i32
    %c0_i32_4 = arith.constant 0 : i32
    return %c0_i32_3, %9 : i32, i32
  }
  func.func @transform_2(%arg0: i32, %arg1: i32) -> (i32, i32) {
    %c2_i32 = arith.constant 2 : i32
    %c0_i32 = arith.constant 0 : i32
    %0 = arith.cmpi eq, %c2_i32, %c0_i32 : i32
    %c1_i32 = arith.constant 1 : i32
    %1 = arith.select %0, %c1_i32, %c2_i32 : i32
    %2 = arith.remsi %arg0, %1 : i32
    %c0_i32_0 = arith.constant 0 : i32
    %3 = arith.cmpi ne, %2, %c0_i32_0 : i32
    %c0_i32_1 = arith.constant 0 : i32
    %4 = arith.cmpi slt, %2, %c0_i32_1 : i32
    %c0_i32_2 = arith.constant 0 : i32
    %5 = arith.cmpi slt, %1, %c0_i32_2 : i32
    %6 = arith.xori %4, %5 : i1
    %7 = arith.andi %6, %3 : i1
    %8 = arith.addi %2, %1 : i32
    %9 = arith.select %7, %8, %2 : i32
    %c0_i32_3 = arith.constant 0 : i32
    %c0_i32_4 = arith.constant 0 : i32
    return %c0_i32_3, %9 : i32, i32
  }
  func.func @transform_3(%arg0: i32, %arg1: i32) -> (i32, i32) {
    %c2_i32 = arith.constant 2 : i32
    %c0_i32 = arith.constant 0 : i32
    %0 = arith.cmpi eq, %c2_i32, %c0_i32 : i32
    %c1_i32 = arith.constant 1 : i32
    %1 = arith.select %0, %c1_i32, %c2_i32 : i32
    %2 = arith.remsi %arg0, %1 : i32
    %c0_i32_0 = arith.constant 0 : i32
    %3 = arith.cmpi ne, %2, %c0_i32_0 : i32
    %c0_i32_1 = arith.constant 0 : i32
    %4 = arith.cmpi slt, %2, %c0_i32_1 : i32
    %c0_i32_2 = arith.constant 0 : i32
    %5 = arith.cmpi slt, %1, %c0_i32_2 : i32
    %6 = arith.xori %4, %5 : i1
    %7 = arith.andi %6, %3 : i1
    %8 = arith.addi %2, %1 : i32
    %9 = arith.select %7, %8, %2 : i32
    %c0_i32_3 = arith.constant 0 : i32
    %c0_i32_4 = arith.constant 0 : i32
    return %c0_i32_3, %9 : i32, i32
  }
  func.func @transform_4(%arg0: i32, %arg1: i32) -> (i32, i32) {
    %c2_i32 = arith.constant 2 : i32
    %c0_i32 = arith.constant 0 : i32
    %0 = arith.cmpi eq, %c2_i32, %c0_i32 : i32
    %c1_i32 = arith.constant 1 : i32
    %1 = arith.select %0, %c1_i32, %c2_i32 : i32
    %2 = arith.remsi %arg0, %1 : i32
    %c0_i32_0 = arith.constant 0 : i32
    %3 = arith.cmpi ne, %2, %c0_i32_0 : i32
    %c0_i32_1 = arith.constant 0 : i32
    %4 = arith.cmpi slt, %2, %c0_i32_1 : i32
    %c0_i32_2 = arith.constant 0 : i32
    %5 = arith.cmpi slt, %1, %c0_i32_2 : i32
    %6 = arith.xori %4, %5 : i1
    %7 = arith.andi %6, %3 : i1
    %8 = arith.addi %2, %1 : i32
    %9 = arith.select %7, %8, %2 : i32
    %c0_i32_3 = arith.constant 0 : i32
    %c0_i32_4 = arith.constant 0 : i32
    return %c0_i32_3, %9 : i32, i32
  }
  func.func @transform_5(%arg0: i32, %arg1: i32) -> (i32, i32) {
    %c2_i32 = arith.constant 2 : i32
    %c0_i32 = arith.constant 0 : i32
    %0 = arith.cmpi eq, %c2_i32, %c0_i32 : i32
    %c1_i32 = arith.constant 1 : i32
    %1 = arith.select %0, %c1_i32, %c2_i32 : i32
    %2 = arith.remsi %arg0, %1 : i32
    %c0_i32_0 = arith.constant 0 : i32
    %3 = arith.cmpi ne, %2, %c0_i32_0 : i32
    %c0_i32_1 = arith.constant 0 : i32
    %4 = arith.cmpi slt, %2, %c0_i32_1 : i32
    %c0_i32_2 = arith.constant 0 : i32
    %5 = arith.cmpi slt, %1, %c0_i32_2 : i32
    %6 = arith.xori %4, %5 : i1
    %7 = arith.andi %6, %3 : i1
    %8 = arith.addi %2, %1 : i32
    %9 = arith.select %7, %8, %2 : i32
    %c0_i32_3 = arith.constant 0 : i32
    %c0_i32_4 = arith.constant 0 : i32
    return %c0_i32_3, %9 : i32, i32
  }
  func.func @transform_6(%arg0: i32, %arg1: i32) -> (i32, i32) {
    %c0_i32 = arith.constant 0 : i32
    return %arg1, %arg0 : i32, i32
  }
}

</mosaic_0001>

<bundles_post_ra>
// kernel: tpu_custom_call.1
= control target key start
LH: loop header
LB: loop body
LE: loop exit
PB: predicated region body
PF: predicated region fallthrough
CT: control target
= control target key end

     0   :  { %s2161_s0 = inlined_call_operand.hbm [shape: f32[32,512], index: 0, kind: input, shape index: {}]   ;;  %s2162_s1 = inlined_call_operand.hbm [shape: f32[64,256], index: 1, kind: input, shape index: {}]   ;;  %s2163_s2 = inlined_call_operand.hbm [shape: f32[16,256], index: 2, kind: input, shape index: {}]   ;;  %s2164_s3 = inlined_call_operand.hbm [shape: f32[16,256], index: 3, kind: input, shape index: {}]   ;;  %s2165_s4 = inlined_call_operand.vmem [shape: f32[2,256], index: 4, kind: input, shape index: {}]   ;;  %s2166_s5 = inlined_call_operand.vmem [shape: f32[1,256], index: 5, kind: input, shape index: {}]   ;;  %s2167_s6 = inlined_call_operand.hbm [shape: f32[32,512], index: 6, kind: output, shape index: {}]  }
   0x1   :  { %2196 = sst [smem:[#allocation29_spill]] %s2161_s0 }
   0x2   :  { %2197 = sst [smem:[#allocation30_spill]] %s2162_s1 }
   0x3   :  { %2198 = sst [smem:[#allocation31_spill]] %s2165_s4 }
   0x4   :  { %2199 = sst [smem:[#allocation32_spill]] %s2166_s5 }
   0x5   :  { %2200 = sst [smem:[#allocation33_spill]] %s2167_s6 }
   0x6   :  { %11 = vsyncpa [#allocation4], 0 }
   0x7   :  { %13 = vsyncpa [#allocation4 + $0x1], 0 }
   0x8   :  { %14 = vsyncpa [#allocation7], 0 }
   0x9   :  { %16 = vsyncpa [#allocation7 + $0x1], 0 }
   0xa   :  { %17 = vsyncpa [#allocation10], 0 }
   0xb   :  { %19 = vsyncpa [#allocation10 + $0x1], 0 }
   0xc   :  { %20 = vsyncpa [#allocation5], 0 }
   0xd   :  { %22 = vsyncpa [#allocation5 + $0x1], 0  ;;  %s1635_s21 = smov 0   ;;  %s1637_s22 = smov 0  }
   0xe   :  { %s1639_s23 = smov 0   ;;  %s1641_s24 = smov 0  }
   0xf   :  { %s1643_s25 = smov 0   ;;  %s1645_s26 = smov 0  }
  0x10   :  { %s1647_s27 = smov 0   ;;  %s1649_s28 = smov 0  }
  0x11   :  { %s1651_s29 = smov 0   ;;  %s1653_s30 = smov 0  }
  0x12   :  { %s1655_s7 = smov 0  }
  0x13 LB: > { %2201 = sst [smem:[#allocation16_spill]] %s1545_s24  ;;  %p2170_p0 = scmp.eq.s32.totalorder %s1573_s7, 0  ;;  %s1573_s7 = sphi %s1655_s7, %s28_s7   ;;  %s1569_s30 = sphi %s1653_s30, %s2270_s30   ;;  %s1565_s29 = sphi %s1651_s29, %s2269_s29   ;;  %s1561_s28 = sphi %s1649_s28, %s2268_s28   ;;  %s1557_s27 = sphi %s1647_s27, %s2267_s27   ;;  %s1553_s26 = sphi %s1645_s26, %s2259_s26   ;;  %s1549_s25 = sphi %s1643_s25, %s2266_s25   ;;  %s1545_s24 = sphi %s1641_s24, %s2265_s24   ;;  %s1541_s23 = sphi %s1639_s23, %s2264_s23   ;;  %s1537_s22 = sphi %s1637_s22, %s2263_s22   ;;  %s1533_s21 = sphi %s1635_s21, %s2262_s21  }
  0x14   : > { %2202 = sst [smem:[#allocation17_spill]] %s1553_s26  ;;  %s73_s8 = ssub.s32 0, %s1569_s30 }
  0x15   : > { %2203 = sst [smem:[#allocation18_spill]] %s1557_s27  ;;  %s1082_s10 = smin.u32 %s1569_s30, %s73_s8 }
  0x16   : > { %2204 = sst [smem:[#allocation19_spill]] %s1561_s28  ;;  %p106_p1 = scmp.ne.s32.totalorder %s1541_s23, %s1537_s22 }
  0x17   : > { %s75_s11 = sand.u32 1, %s1082_s10   ;;  %p2169_p4 = scmp.lt.s32.totalorder %s1573_s7, 8 }
  0x18   : > { %p1700_p3 = por %p106_p1, %p2170_p0  ;;  %p1084_p5 = scmp.lt.s32.totalorder %s75_s11, 0 }
  0x19   : > { %s82_s13 = sadd.s32 2, %s75_s11  ;;  %s387_s14 = sand.u32 1, %s1573_s7  }
  0x1a   : > { %s2272_s13 = smov (!%p1084_p5, %s82_s13), %s75_s11  ;;  %s1709_s15 = sand.u32 1, %s1541_s23  }
  0x1b   : > { %s1118_s16 = sshll.u32 %s1709_s15, 6  ;;  %s1713_s17 = sshll.u32 %s2272_s13, 7 }
  0x1c   : > { %s2206_s1 = sld [smem:[#allocation30_spill]]  ;;  %s391_s8 = scalar_lea.vmem [#allocation6], %s1118_s16 }
  0x1d   : > { %s409_s10 = sshll.u32 %s391_s8, 4  ;;  %p1727_p6 = pnand %p2169_p4, %p1700_p3  ;;  %s1721_s10 = int_to_ptr.vmem [resolvable:$true] %s409_s10 }
  0x1e   : > { %s1733_s18 = scalar_lea.sflag [#allocation7], %s387_s14 }
  0x1f   : > { %s2207_s11 = scalar_select %p1727_p6, 1, 0 }
  0x20   : > { %p1739_p10 = pneg %p1727_p6 }
  0x22   : > { %s1719_s20 = scalar_lea.hbm %s2206_s1, %s1713_s17  ;;  %s1316_s9 = scalar_lea.hbm %s2206_s1, 2048 }
  0x23   : > { %s1311_s19 = scalar_lea.hbm %s1719_s20, 1024  ;;  %p1317_p13 = scmp.lt.u32.totalorder %s1719_s20, %s2206_s1 }
  0x24   : > { %p1312_p9 = scmp.ne.s32.totalorder %s1719_s20, %s1311_s19  ;;  %p1318_p1 = scmp.lt.u32.totalorder %s1316_s9, %s1311_s19 }
  0x25   : > { %p1320_p5 = scmp.lt.u32.totalorder %s1311_s19, %s1719_s20 }
  0x26   : > { %p1314_p11 = pnand %p1739_p10, %p1312_p9  ;;  %p1319_p3 = por %p1318_p1, %p1317_p13 }
  0x28   : > { %p1315_p12 = pneg %p1314_p11  ;;  %p1321_p4 = por %p1320_p5, %p1319_p3 }
  0x2a   : > { %p1322_p2 = pnand %p1321_p4, %p1315_p12 }
  0x2c   : > { %1325 = shalt.err (!%p1322_p2)
}
  0x2d   : > { %s1326_s14 = scalar_lea.vmem %s1721_s10, 1024  ;;  %s1587_s12 = smov [#allocation6]  }
  0x2e   : > { %p1327_p9 = scmp.ne.s32.totalorder %s1721_s10, %s1326_s14  ;;  %s1331_s8 = sshll.u32 %s1587_s12, 4  ;;  %s1332_s8 = int_to_ptr.vmem [resolvable:$false] %s1331_s8 }
  0x2f   : > { %s1333_s6 = scalar_lea.vmem %s1332_s8, 2048  ;;  %p1334_p7 = scmp.lt.s32.totalorder %s1721_s10, %s1332_s8 }
  0x30   : > { %p1329_p11 = pnand %p1327_p9, %p1739_p10  ;;  %p1335_p8 = scmp.lt.s32.totalorder %s1333_s6, %s1326_s14 }
  0x32   : > { %p1330_p0 = pneg %p1329_p11  ;;  %p1336_p13 = por %p1335_p8, %p1334_p7 }
  0x34   : > { %p1337_p1 = pnand %p1336_p13, %p1330_p0 }
  0x36   : > { %1340 = shalt.err (!%p1337_p1)
}
  0x37   : > { %s2171_s27 = smov 256   ;;  %s2173_s9 = smov 128  }
  0x38   : > { %s2175_s19 = smov 8   ;;  %p2209_p0 = scmp.lt.s32.totalorder %s1573_s7, 9 }
  0x39   : > { %1174 = dma.hbm_to_vmem [thread:$0]  (!%p1727_p6), %s1719_s20, 1024, %s1721_s10, %s1733_s18, %s2171_s27, %s2173_s9, %s2175_s19  }
  0x3a   : > { %p2210_p2 = scmp.ge.s32.totalorder %s1573_s7, 1  ;;  %s1775_s12 = sadd.s32 4294967295, %s1573_s7  }
  0x3b   : > { %2213 = sst [smem:[#allocation21_spill]] %s1775_s12  ;;  %s1081_s8 = sadd.s32 4294967294, %s1573_s7  }
  0x3c   : > { %p1770_p4 = pnand %p2210_p2, %p2209_p0  ;;  %s37_s6 = sadd.s32 1, %s1565_s29 }
  0x3d   : > { %p38_p7 = scmp.ge.s32.totalorder %s37_s6, 2  ;;  %s40_s1 = sadd.s32 1, %s1569_s30 }
  0x3e   : > { %s2211_s14 = scalar_select %p1770_p4, 1, 0 }
  0x3f   : > { %s49_s20 = sadd.s32 1, %s1553_s26  ;;  %p56_p8 = scmp.ne.s32.totalorder %s1553_s26, %s1549_s25 }
  0x40   : > { %2212 = sst [smem:[#allocation20_spill]] %s2211_s14  ;;  %s2274_s6 = smov (%p38_p7, %s37_s6), 0 }
  0x41   : > { %2214 = sst [smem:[#allocation22_spill]] %s2274_s6  ;;  %s2276_s1 = smov (!%p38_p7, %s40_s1), %s1569_s30 }
  0x42   : > { %s44_s10 = ssub.s32 %s1565_s29, %s2274_s6  ;;  %p2215_p12 = scmp.eq.s32.totalorder %s1573_s7, 0 }
  0x43   : > { %p42_p5 = scmp.ge.s32.totalorder %s2276_s1, 4  ;;  %p62_p9 = scmp.ne.s32.totalorder %s1549_s25, %s1545_s24 }
  0x44   : > { %p1793_p3 = por %p2215_p12, %p56_p8  ;;  %p63_p11 = scmp.eq.s32.totalorder %s1775_s12, 0 }
  0x45   : > { %p338_p13 = scmp.eq.s32.totalorder %s1775_s12, 7  ;;  %s2278_s1 = smov (%p42_p5, %s2276_s1), 0 }
  0x46   : > { %2217 = sst [smem:[#allocation23_spill]] %s2278_s1  ;;  %p1806_p1 = por %p63_p11, %p62_p9 }
  0x47   : > { %p2220_p0 = scmp.ne.s32.totalorder %s1537_s22, %s1533_s21  ;;  %s45_s6 = ssub.s32 %s1569_s30, %s2278_s1 }
  0x48   : > { %s2218_s9 = scalar_select %p1806_p1, 1, 0 }
  0x49   : > { %p1813_p2 = por %p2220_p0, %p63_p11  ;;  %s46_s4 = sor.u32 %s45_s6, %s44_s10 }
  0x4a   : > { %2219 = sst [smem:[#allocation24_spill]] %s2218_s9  ;;  %s85_s5 = ssub.s32 0, %s2278_s1 }
  0x4b   : > { %s2221_s19 = scalar_select %p1813_p2, 1, 0 }
  0x4c   : > { %p47_p7 = scmp.eq.s32.totalorder %s46_s4, 0  ;;  %s1085_s28 = smin.u32 %s85_s5, %s2278_s1 }
  0x4d   : > { %2222 = sst [smem:[#allocation25_spill]] %s2221_s19  ;;  %s87_s12 = sand.u32 1, %s1085_s28  }
  0x4e   : > { %p1824_p12 = por %p338_p13, %p56_p8  ;;  %p344_p5 = scmp.eq.s32.totalorder %s1081_s8, 7 }
  0x4f   : > { %s1829_s9 = scalar_select %p47_p7, %s1553_s26, %s49_s20  }
  0x50   : > { %s2223_s14 = scalar_select %p1824_p12, 1, 0 }
  0x51   : > { %2225 = sst [smem:[#allocation27_spill]] %s1829_s9  ;;  %p1834_p11 = por %p344_p5, %p62_p9 }
  0x52   : > { %2224 = sst [smem:[#allocation26_spill]] %s2223_s14  ;;  %s364_s4 = sand.u32 1, %s1553_s26  }
  0x53   : > { %s2226_s21 = scalar_select %p1834_p11, 1, 0 }
  0x54   : > { %p1087_p0 = scmp.lt.s32.totalorder %s87_s12, 0  ;;  %s94_s5 = sadd.s32 2, %s87_s12 }
  0x55   : > { %2227 = sst [smem:[#allocation28_spill]] %s2226_s21  ;;  %s1114_s28 = sshll.u32 %s364_s4, 4 }
  0x56   : > { %s2280_s5 = smov (!%p1087_p0, %s94_s5), %s87_s12  ;;  %s1156_s6 = sshll.u32 %s1565_s29, 3 }
  0x57   : > { %s96_s10 = ssub.s32 %s2272_s13, %s2280_s5  ;;  %s374_s20 = sadd.s32 %s1569_s30, %s1156_s6 }
  0x58   : > { %p97_p8 = scmp.eq.s32.totalorder %s96_s10, 0  ;;  %s1117_s1 = sshll.u32 %s374_s20, 7 }
  0x59   : > { %s2228_s0 = sld [smem:[#allocation29_spill]]  ;;  %s368_s21 = scalar_lea.vmem [#allocation3], %s1114_s28 }
  0x5a   : > { %s377_s26 = sshll.u32 %s368_s21, 4  ;;  %s2229_s14 = sadd.s32 1, %s1541_s23  ;;  %s1852_s26 = int_to_ptr.vmem [resolvable:$true] %s377_s26 }
  0x5b   : > { %s1850_s19 = scalar_select %p97_p8, %s1541_s23, %s2229_s14  }
  0x5c   : > { %p2230_p9 = scmp.lt.s32.totalorder %s1573_s7, 8  ;;  %s1863_s9 = scalar_lea.sflag [#allocation4], %s364_s4 }
  0x5e   : > { %p1858_p13 = pnand %p2230_p9, %p1793_p3 }
  0x5f   : > { %s1845_s24 = scalar_lea.hbm %s2228_s0, %s1117_s1  ;;  %s1123_s1 = sshll.u32 %s1709_s15, 4 }
  0x60   : > { %s1341_s12 = scalar_lea.hbm %s1845_s24, 256  ;;  %p1343_p5 = pneg %p1858_p13 }
  0x61   : > { %p1342_p7 = scmp.ne.s32.totalorder %s1845_s24, %s1341_s12  ;;  %s1346_s21 = scalar_lea.hbm %s2228_s0, 2048 }
  0x62   : > { %p1347_p3 = scmp.lt.u32.totalorder %s1845_s24, %s2228_s0  ;;  %p1348_p9 = scmp.lt.u32.totalorder %s1346_s21, %s1341_s12 }
  0x63   : > { %p1344_p0 = pnand %p1343_p5, %p1342_p7  ;;  %p1350_p12 = scmp.lt.u32.totalorder %s1341_s12, %s1845_s24 }
  0x64   : > { %p1349_p11 = por %p1348_p9, %p1347_p3 }
  0x65   : > { %p1345_p8 = pneg %p1344_p0 }
  0x66   : > { %p1351_p2 = por %p1350_p12, %p1349_p11 }
  0x68   : > { %p1352_p1 = pnand %p1351_p2, %p1345_p8 }
  0x6a   : > { %1355 = shalt.err (!%p1352_p1)
}
  0x6b   : > { %s1356_s4 = scalar_lea.vmem %s1852_s26, 256  ;;  %s1591_s6 = smov [#allocation3]  }
  0x6c   : > { %p1357_p7 = scmp.ne.s32.totalorder %s1852_s26, %s1356_s4  ;;  %s1361_s10 = sshll.u32 %s1591_s6, 4  ;;  %s1362_s10 = int_to_ptr.vmem [resolvable:$false] %s1361_s10 }
  0x6d   : > { %s1363_s20 = scalar_lea.vmem %s1362_s10, 512  ;;  %p1364_p6 = scmp.lt.s32.totalorder %s1852_s26, %s1362_s10 }
  0x6e   : > { %p1359_p0 = pnand %p1357_p7, %p1343_p5  ;;  %p1365_p3 = scmp.lt.s32.totalorder %s1363_s20, %s1356_s4 }
  0x70   : > { %p1360_p4 = pneg %p1359_p0  ;;  %p1366_p9 = por %p1365_p3, %p1364_p6 }
  0x72   : > { %p1367_p12 = pnand %p1366_p9, %p1360_p4 }
  0x74   : > { %1370 = shalt.err (!%p1367_p12)
}
  0x75   : > { %s1592_s8 = smov 512   ;;  %s2232_s12 = smov 8  }
  0x76   : > { %s2233_s14 = smov 128   ;;  %s1897_s5 = scalar_lea.hbm %s2163_s2, %s1713_s17 }
  0x77   : > { %1171 = dma.hbm_to_vmem [thread:$0]  (!%p1858_p13), %s1845_s24, 256, %s1852_s26, %s1863_s9, %s1592_s8, %s2233_s14, %s2232_s12  }
  0x78   : > { %s423_s13 = scalar_lea.vmem [#allocation8], %s1123_s1  ;;  %s1371_s4 = scalar_lea.hbm %s1897_s5, 256 }
  0x79   : > { %s441_s28 = sshll.u32 %s423_s13, 4  ;;  %p1372_p6 = scmp.ne.s32.totalorder %s1897_s5, %s1371_s4  ;;  %s1901_s28 = int_to_ptr.vmem [resolvable:$true] %s441_s28 }
  0x7a   : > { %s1376_s9 = scalar_lea.hbm %s2163_s2, 512  ;;  %p1377_p2 = scmp.lt.u32.totalorder %s1897_s5, %s2163_s2 }
  0x7b   : > { %p1374_p4 = pnand %p1372_p6, %p1739_p10  ;;  %p1378_p11 = scmp.lt.u32.totalorder %s1376_s9, %s1371_s4 }
  0x7c   : > { %p1380_p5 = scmp.lt.u32.totalorder %s1371_s4, %s1897_s5 }
  0x7d   : > { %p1375_p1 = pneg %p1374_p4  ;;  %p1379_p13 = por %p1378_p11, %p1377_p2 }
  0x7f   : > { %p1381_p8 = por %p1380_p5, %p1379_p13 }
  0x81   : > { %p1382_p7 = pnand %p1381_p8, %p1375_p1 }
  0x83   : > { %1385 = shalt.err (!%p1382_p7)
}
  0x84   : > { %s1386_s20 = scalar_lea.vmem %s1901_s28, 256  ;;  %s1593_s8 = smov [#allocation8]  }
  0x85   : > { %p1387_p0 = scmp.ne.s32.totalorder %s1901_s28, %s1386_s20  ;;  %s1391_s27 = sshll.u32 %s1593_s8, 4  ;;  %s1392_s27 = int_to_ptr.vmem [resolvable:$false] %s1391_s27 }
  0x86   : > { %s1393_s21 = scalar_lea.vmem %s1392_s27, 512  ;;  %p1394_p12 = scmp.lt.s32.totalorder %s1901_s28, %s1392_s27 }
  0x87   : > { %p1389_p3 = pnand %p1387_p0, %p1739_p10  ;;  %p1395_p6 = scmp.lt.s32.totalorder %s1393_s21, %s1386_s20 }
  0x89   : > { %p1390_p9 = pneg %p1389_p3  ;;  %p1396_p4 = por %p1395_p6, %p1394_p12 }
  0x8b   : > { %p1397_p2 = pnand %p1396_p4, %p1390_p9 }
  0x8d   : > { %1400 = shalt.err (!%p1397_p2)
}
  0x8e   : > { %p2234_p1 = scmp.ne.s32.totalorder %s2207_s11, 0  ;;  %s2235_s13 = smov 256  }
  0x8f   : > { %s1932_s26 = scalar_lea.hbm %s2164_s3, %s1713_s17  ;;  %s455_s9 = scalar_lea.vmem [#allocation9], %s1123_s1 }
  0x90   : > { %1177 = dma.hbm_to_vmem [thread:$0]  (!%p2234_p1), %s1897_s5, 256, %s1901_s28, %s1733_s18, %s2235_s13, %s2233_s14, %s2232_s12  }
  0x91   : > { %s473_s6 = sshll.u32 %s455_s9, 4  ;;  %s452_s10 = scalar_lea.sflag [#allocation10], %s1709_s15  ;;  %s1936_s6 = int_to_ptr.vmem [resolvable:$true] %s473_s6 }
  0x92   : > { %s1401_s20 = scalar_lea.hbm %s1932_s26, 256  ;;  %s1406_s17 = scalar_lea.hbm %s2164_s3, 512 }
  0x93   : > { %p1402_p11 = scmp.ne.s32.totalorder %s1932_s26, %s1401_s20  ;;  %p1407_p8 = scmp.lt.u32.totalorder %s1932_s26, %s2164_s3 }
  0x94   : > { %p1408_p7 = scmp.lt.u32.totalorder %s1406_s17, %s1401_s20  ;;  %p1410_p3 = scmp.lt.u32.totalorder %s1401_s20, %s1932_s26 }
  0x95   : > { %p1404_p13 = pnand %p1402_p11, %p1739_p10 }
  0x96   : > { %p1409_p0 = por %p1408_p7, %p1407_p8 }
  0x97   : > { %p1405_p5 = pneg %p1404_p13 }
  0x98   : > { %p1411_p9 = por %p1410_p3, %p1409_p0 }
  0x9a   : > { %p1412_p12 = pnand %p1411_p9, %p1405_p5 }
  0x9c   : > { %1415 = shalt.err (!%p1412_p12)
}
  0x9d   : > { %s1416_s1 = scalar_lea.vmem %s1936_s6, 256  ;;  %s1594_s27 = smov [#allocation9]  }
  0x9e   : > { %p1417_p6 = scmp.ne.s32.totalorder %s1936_s6, %s1416_s1  ;;  %s1421_s21 = sshll.u32 %s1594_s27, 4  ;;  %s1422_s21 = int_to_ptr.vmem [resolvable:$false] %s1421_s21 }
  0x9f   : > { %s1423_s4 = scalar_lea.vmem %s1422_s21, 512  ;;  %p1424_p11 = scmp.lt.s32.totalorder %s1936_s6, %s1422_s21 }
  0xa0   : > { %p1419_p4 = pnand %p1417_p6, %p1739_p10  ;;  %p1425_p13 = scmp.lt.s32.totalorder %s1423_s4, %s1416_s1 }
  0xa2   : > { %p1420_p2 = pneg %p1419_p4  ;;  %p1426_p8 = por %p1425_p13, %p1424_p11 }
  0xa4   : > { %p1427_p7 = pnand %p1426_p8, %p1420_p2 }
  0xa6   : > { %1430 = shalt.err (!%p1427_p7)
}
  0xa7   : > { %1180 = dma.hbm_to_vmem [thread:$0]  (!%p2234_p1), %s1932_s26, 256, %s1936_s6, %s452_s10, %s2235_s13, %s2233_s14, %s2232_s12  }
  0xa8   : > { %s2236_s16 = sld [smem:[#allocation20_spill]] }
  0xae   : > { %p2237_p10 = scmp.ne.s32.totalorder %s2236_s16, 0 }
  0xaf   : > { %s2238_s24 = sld [smem:[#allocation24_spill]] (!%p2237_p10)  ;;  %s1968_s9 = sand.u32 (!%p2237_p10), 1, %s1549_s25  }
  0xb0   : > { %546 = sbr.rel (%p2237_p10) target bundleno = 301 (0x12d), region = 44  ;;  %s1134_s20 = sshll.u32 (!%p2237_p10), %s1968_s9, 4 }
  0xb1   : > { %s549_s11 = scalar_lea.sflag (!%p2237_p10), [#allocation4], %s1968_s9  ;;  %s1974_s18 = scalar_lea.vmem (!%p2237_p10), [#allocation3], %s1134_s20 }
  0xb5   : > { %p2239_p5 = scmp.ne.s32.totalorder (!%p2237_p10), %s2238_s24, 0 }
  0xb7   : > { %1516 = dma.done.wait (%p2239_p5), %s549_s11, 256  }
  0xb8   : > { %1518 = vsyncadd (%p2239_p5), %s549_s11, 4294967040  ;;  %s2240_s15 = sld [smem:[#allocation21_spill]]  ;;  %s2241_s12 = sld [smem:[#allocation25_spill]] }
  0xb9   : > { %s559_s13 = sand.u32 1, %s1537_s22  }
  0xba   : > { %s1135_s26 = sshll.u32 %s559_s13, 6 }
  0xbb   : > { %s1982_s10 = scalar_lea.vmem [#allocation6], %s1135_s26 }
  0xbe   : > { %s557_s14 = sand.u32 1, %s2240_s15   ;;  %p2242_p1 = scmp.ne.s32.totalorder %s2241_s12, 0 }
  0xbf   : > { %s558_s6 = scalar_lea.sflag [#allocation7], %s557_s14 }
  0xc0   : > { %1520 = dma.done.wait (%p2242_p1), %s558_s6, 1280  }
  0xc1   : > { %1522 = vsyncadd (%p2242_p1), %s558_s6, 4294966016  ;;  %s1136_s5 = sshll.u32 %s559_s13, 4  ;;  %s576_s28 = scalar_lea.sflag [#allocation10], %s559_s13 }
  0xc2   : > { %s1988_s17 = scalar_lea.vmem [#allocation8], %s1136_s5  ;;  %s1990_s8 = scalar_lea.vmem [#allocation9], %s1136_s5 }
  0xc3   : > { %1524 = dma.done.wait (%p2242_p1), %s576_s28, 256  }
  0xc4   : > { %1526 = vsyncadd (%p2242_p1), %s576_s28, 4294967040  ;;  %s2243_s1 = sld [smem:[#allocation19_spill]]  ;;  %s2245_s5 = sld [smem:[#allocation31_spill]] }
  0xc5   : > { %s2244_s12 = sld [smem:[#allocation32_spill]]  ;;  %s2007_s0 = scalar_lea.vmem [#allocation11], %s1134_s20 }
  0xca   : > { %p691_p0 = scmp.lt.s32.totalorder %s2243_s1, 0  ;;  %s692_s27 = ssub.s32 0, %s2243_s1 }
  0xcb   : > { %s1139_s21 = smin.u32 %s2243_s1, %s692_s27  ;;  %s2246_s1 = sld [smem:[#allocation18_spill]] }
  0xcc   : > { %s694_s4 = sand.u32 1, %s1139_s21  }
  0xcd   : > { %s695_s16 = ssub.s32 0, %s694_s4 }
  0xce   : > { %s2282_s16 = smov (!%p691_p0, %s695_s16), %s694_s4 }
  0xcf   : > { %p1141_p3 = scmp.lt.s32.totalorder %s2282_s16, 0  ;;  %s701_s24 = sadd.s32 2, %s2282_s16 }
  0xd1   : > { %s2284_s24 = smov (!%p1141_p3, %s701_s24), %s2282_s16  ;;  %p1146_p12 = scmp.ne.s32.totalorder %s2246_s1, 0 }
  0xd2   : > { %p703_p9 = scmp.lt.s32.totalorder %s2284_s24, 1  ;;  %v1595_v0 = vmov (!%p1146_p12), 0.0  }
  0xd3   : > { %750 = sbr.rel (%p1146_p12) target bundleno = 218 (0xda), region = 64  ;;  %751 = vst [vmem:[#allocation2] sm:$0x3] (!%p1146_p12), %v1595_v0 }
  0xd4   : > { %s2286_s24 = smov (!%p703_p9, %s2284_s24), 1 }
  0xd5   : > { %s1142_s11 = sshll.u32 %s2286_s24, 1  ;;  %s733_s13 = scalar_lea.vmem %s2244_s12, %s2286_s24 }
  0xd6   : > { %s706_s28 = scalar_lea.vmem %s2245_s5, %s1142_s11 }
  0xda PF: > { %v2011_v1 = vld [vmem:[%s1982_s10] sm:$0xff]  ;;  %v2014_v2 = vld [vmem:[%s1982_s10 + $0x8] sm:$0xff]  ;;  %v2017_v3 = vld [vmem:[%s1982_s10 + $0x10] sm:$0xff]  ;;  %s2054_s20 = smov 0  }
  0xdb   : > { %v2020_v4 = vld [vmem:[%s1982_s10 + $0x18] sm:$0xff]  ;;  %v2023_v5 = vld [vmem:[%s1982_s10 + $0x20] sm:$0xff]  ;;  %v2026_v6 = vld [vmem:[%s1982_s10 + $0x28] sm:$0xff] }
  0xdc   : > { %v2029_v7 = vld [vmem:[%s1982_s10 + $0x30] sm:$0xff]  ;;  %v2032_v8 = vld [vmem:[%s1982_s10 + $0x38] sm:$0xff] }
  0xdd   : > { %v2035_v9 = vld [vmem:[%s1988_s17] sm:$0xff]  ;;  %v2038_v10 = vld [vmem:[%s1988_s17 + $0x8] sm:$0xff] }
  0xde   : > { %v2041_v11 = vld [vmem:[%s1990_s8] sm:$0xff]  ;;  %v2044_v12 = vld [vmem:[%s1990_s8 + $0x8] sm:$0xff] }
  0xdf   : > { %v2046_v13 = vld [vmem:[%s706_s28] sm:$0x3] }
  0xe0   : > { %v2048_v14 = vld [vmem:[%s733_s13] ss:$0 sm:$0xff] }
  0xe1   : > { %v766_v15 = vld [vmem:[#allocation2] sm:$0x3]  }
  0xe2   : > { %v2247_v16 = vmov %v766_v15 }
  0xe3 LB: >> { %v778_v17 = vlaneseq  ;;  %s1147_s10 = sshll.u32 %s1585_s20, 3  ;;  %v861_v0 = vmul.f32 %v1581_v15, %v2046_v13  ;;  %s772_s20 = sadd.s32 1, %s1585_s20   ;;  %s1585_s20 = sphi %s2054_s20, %s772_s20   ;;  %v1581_v15 = vphi %v766_v15, %v2249_v15   ;;  %v1577_v16 = vphi %v2247_v16, %v2248_v16  }
  0xe4   : >> { %s776_s17 = scalar_lea.vmem %s1974_s18, %s1147_s10 [#allocation3]  ;;  %s852_s8 = scalar_lea.vmem %s2007_s0, %s1147_s10 [#allocation11] }
  0xe5   : >> { %v779_v18 = vshrl.u32 %v778_v17, 7  ;;  %v777_v19 = vld [vmem:[%s776_s17] sm:$0xff]  ;;  %p769_p6 = scmp.ge.s32.totalorder %s772_s20, 2  }
  0xe6   : >> { %v854_v39 = vmul.f32 %v777_v19, %v2041_v11  ;;  %v863_v40 = vmul.f32 %v777_v19, %v2044_v12  ;;  %s2250_s27 = sld [smem:[#allocation18_spill]] (%p769_p6)  ;;  %s2251_s21 = sld [smem:[#allocation19_spill]] (%p769_p6) }
  0xe7   : >> { %v780_v20 = vsub.s32 0, %v779_v18  ;;  %v785_v21 = vsub.s32 1, %v779_v18  ;;  %v791_v22 = vsub.s32 2, %v779_v18  ;;  %v797_v23 = vsub.s32 3, %v779_v18  ;;  %s2252_s4 = sld [smem:[#allocation26_spill]] (%p769_p6)  ;;  %s890_s11 = sshll.u32 (%p769_p6), %s2007_s0, 4  ;;  %s2093_s11 = int_to_ptr.vmem [resolvable:$true] %s890_s11 }
  0xe8   : >> { %v803_v24 = vsub.s32 4, %v779_v18  ;;  %v809_v25 = vsub.s32 5, %v779_v18  ;;  %v815_v30 = vsub.s32 6, %v779_v18  ;;  %v821_v38 = vsub.s32 7, %v779_v18  ;;  %s2253_s13 = sld [smem:[#allocation33_spill]] (%p769_p6)  ;;  %s875_s18 = scalar_lea.sflag (%p769_p6), [#allocation5], %s1968_s9 }
  0xe9   : >> { %v781_v26 = vrot.slane %v777_v19, %v780_v20  ;;  %v786_v27 = vrot.slane %v777_v19, %v785_v21  ;;  %v792_v28 = vrot.slane %v777_v19, %v791_v22  ;;  %v798_v29 = vrot.slane %v777_v19, %v797_v23  ;;  %s1431_s6 = scalar_lea.vmem (%p769_p6), %s2093_s11, 256  ;;  %s1596_s5 = smov (%p769_p6), [#allocation11]  }
  0xea   : >> { %v804_v34 = vrot.slane %v777_v19, %v803_v24  ;;  %v810_v37 = vrot.slane %v777_v19, %v809_v25  ;;  %v816_v43 = vrot.slane %v777_v19, %v815_v30  ;;  %v855_v44 = vrot.slane %v854_v39, 4  ;;  %p1432_p4 = scmp.ne.s32.totalorder (%p769_p6), %s2093_s11, %s1431_s6  ;;  %s1435_s28 = sshll.u32 (%p769_p6), %s1596_s5, 4  ;;  %s1436_s28 = int_to_ptr.vmem [resolvable:$false] %s1435_s28 }
  0xeb   : >> { %v782_v31 = vmul.f32 %v781_v26, %v2011_v1  ;;  %v787_v32 = vmul.f32 %v786_v27, %v2014_v2  ;;  %v793_v33 = vmul.f32 %v792_v28, %v2017_v3  ;;  %v799_v36 = vmul.f32 %v798_v29, %v2020_v4  ;;  %s1437_s0 = scalar_lea.vmem (%p769_p6), %s1436_s28, 512  ;;  %p1438_p8 = scmp.lt.s32.totalorder (%p769_p6), %s2093_s11, %s1436_s28 }
  0xec   : >> { %v805_v42 = vmul.f32 %v804_v34, %v2023_v5  ;;  %v864_v45 = vrot.slane %v863_v40, 4  ;;  %v811_v47 = vmul.f32 %v810_v37, %v2026_v6  ;;  %v822_v48 = vrot.slane %v777_v19, %v821_v38  ;;  %s1157_s16 = sshll.u32 (%p769_p6), %s2250_s27, 3  ;;  %p1439_p7 = scmp.lt.s32.totalorder (%p769_p6), %s1437_s0, %s1431_s6 }
  0xed   : >> { %v788_v35 = vadd.f32 %v787_v32, %v782_v31  ;;  %v856_v49 = vadd.f32 %v855_v44, %v854_v39  ;;  %v817_v52 = vmul.f32 %v816_v43, %v2029_v7  ;;  %v828_v53 = vrot.slane %v1581_v15, %v780_v20  ;;  %s887_s24 = sadd.s32 (%p769_p6), %s2251_s21, %s1157_s16  ;;  %p2254_p2 = scmp.ne.s32.totalorder (%p769_p6), %s2252_s4, 0 }
  0xee   : >> { %v865_v50 = vadd.f32 %v864_v45, %v863_v40  ;;  %v823_v57 = vmul.f32 %v822_v48, %v2032_v8  ;;  %v834_v58 = vrot.slane %v1577_v16, %v785_v21  ;;  %v870_v18 = vmul.f32 %v1577_v16, %v2046_v13  ;;  %s1153_s15 = sshll.u32 (%p769_p6), %s887_s24, 7  ;;  %p1440_p10 = por (%p769_p6), %p1439_p7, %p1438_p8 }
  0xef   : >> { %v794_v41 = vadd.f32 %v793_v33, %v788_v35  ;;  %v857_v54 = vrot.slane %v856_v49, 2  ;;  %v829_v62 = vmul.f32 %v828_v53, %v2035_v9  ;;  %v843_v21 = vmul.f32 %v2048_v14, %v777_v19  ;;  %s2098_s26 = scalar_lea.hbm (%p769_p6), %s2253_s13, %s1153_s15  ;;  %p1433_p11 = pnand (%p769_p6), %p1432_p4, %p2254_p2 }
  0xf0   : >> { %v866_v55 = vrot.slane %v865_v50, 2  ;;  %v835_v20 = vmul.f32 %v834_v58, %v2038_v10 }
  0xf1   : >> { %v800_v46 = vadd.f32 %v799_v36, %v794_v41  ;;  %v858_v59 = vadd.f32 %v857_v54, %v856_v49  ;;  %p1434_p13 = pneg (%p769_p6), %p1433_p11 }
  0xf2   : >> { %v867_v60 = vadd.f32 %v866_v55, %v865_v50 }
  0xf3   : >> { %v806_v51 = vadd.f32 %v805_v42, %v800_v46  ;;  %v859_v63 = vrot.slane %v858_v59, 1  ;;  %p1441_p5 = pnand (%p769_p6), %p1440_p10, %p1434_p13 }
  0xf4   : >> { %v868_v17 = vrot.slane %v867_v60, 1 }
  0xf5   : >> { %v812_v56 = vadd.f32 %v811_v47, %v806_v51  ;;  %v860_v23 = vadd.f32 %v859_v63, %v858_v59 }
  0xf6   : >> { %v869_v24 = vadd.f32 %v868_v17, %v867_v60 }
  0xf7   : >> { %v818_v61 = vadd.f32 %v817_v52, %v812_v56  ;;  %v862_v26 = vadd.f32 %v861_v0, %v860_v23  }
  0xf8   : >> { %v871_v27 = vadd.f32 %v870_v18, %v869_v24  }
  0xf9   : >> { %v824_v22 = vadd.f32 %v823_v57, %v818_v61  ;;  %872 = vst [vmem:[#allocation2] sm:$0x1] (%p769_p6), %v862_v26 }
  0xfa   : > { %873 = vst [vmem:[#allocation2] sm:$0x2] (%p769_p6), %v871_v27 }
  0xfb   : >> { %v830_v25 = vadd.f32 %v829_v62, %v824_v22 }
  0xfd   : >> { %v836_v28 = vadd.f32 %v835_v20, %v830_v25 }
  0xff   : >> { %v844_v29 = vadd.f32 %v843_v21, %v836_v28 }
 0x101   : >> { %v1149_v30 = vmul.f32 -1.442695, %v844_v29 }
 0x103   : >> { %1307 = vpow2.f32 %v1149_v30 }
 0x10d   : >> { %v1308_v15 = vpop.eup %1307 }
 0x10e   : >> { %v848_v31 = vadd.f32 1.0, %v1308_v15  ;;  %v2249_v15 = vmov %v862_v26 }
 0x110   : >> { %1309 = vrcp.f32 %v848_v31 }
 0x117   : > { %771 = sbr.rel (!%p769_p6) target bundleno = 227 (0xe3), region = 145 }
 0x11a   : >> { %v1310_v16 = vpop.eup %1309 }
 0x11b   : >> { %v851_v32 = vmul.f32 %v1310_v16, %v844_v29  ;;  %v2248_v16 = vmov %v871_v27 }
 0x11d   : >> { %853 = vst [vmem:[%s852_s8] sm:$0xff] %v851_v32 }
 0x11e   : > { %1444 = shalt.err (!%p1441_p5)
}
 0x11f   : > { %s1445_s1 = scalar_lea.hbm %s2098_s26, 256  ;;  %s1449_s17 = scalar_lea.hbm %s2253_s13, 2048 }
 0x120   : > { %p1446_p1 = scmp.ne.s32.totalorder %s2098_s26, %s1445_s1  ;;  %p1450_p9 = scmp.lt.u32.totalorder %s2098_s26, %s2253_s13 }
 0x121   : > { %p1451_p12 = scmp.lt.u32.totalorder %s1449_s17, %s1445_s1  ;;  %p1453_p4 = scmp.lt.u32.totalorder %s1445_s1, %s2098_s26 }
 0x122   : > { %p1447_p0 = pnand %p1446_p1, %p2254_p2 }
 0x123   : > { %p1452_p6 = por %p1451_p12, %p1450_p9 }
 0x124   : > { %p1448_p3 = pneg %p1447_p0 }
 0x125   : > { %p1454_p11 = por %p1453_p4, %p1452_p6 }
 0x127   : > { %p1455_p13 = pnand %p1454_p11, %p1448_p3 }
 0x129   : > { %1458 = shalt.err (!%p1455_p13)
}
 0x12a   : > { %s1597_s21 = smov 128   ;;  %s1598_s16 = smov 512  }
 0x12b   : > { %s1599_s24 = smov 8  }
 0x12c   : > { %1166 = dma.vmem_to_hbm [thread:$0]  (%p2254_p2), %s2093_s11, 256, %s2098_s26, %s875_s18, %s1597_s21, %s1598_s16, %s1599_s24  }
 0x12d PF: > { %s2255_s15 = sld [smem:[#allocation16_spill]]  ;;  %p1186_p8 = scmp.ge.s32.totalorder %s1573_s7, 2 }
 0x12e   : > { %s2256_s14 = sld [smem:[#allocation28_spill]] }
 0x133   : > { %s905_s12 = sand.u32 1, %s2255_s15  }
 0x134   : > { %p2257_p7 = scmp.ne.s32.totalorder %s2256_s14, 0  ;;  %s906_s6 = scalar_lea.sflag [#allocation5], %s905_s12 }
 0x136   : > { %p1182_p10 = pnand %p1186_p8, %p2257_p7 }
 0x138   : > { %1528 = dma.done.wait (!%p1182_p10), %s906_s6, 256  }
 0x139   : > { %1530 = vsyncadd (!%p1182_p10), %s906_s6, 4294967040  ;;  %s28_s7 = sadd.s32 1, %s1573_s7   ;;  %s2258_s9 = sld [smem:[#allocation17_spill]] }
 0x13a   : > { %p25_p5 = scmp.ge.s32.totalorder %s28_s7, 10   ;;  %s2259_s26 = sld [smem:[#allocation27_spill]] }
 0x13b   : > { %s2260_s4 = sld [smem:[#allocation22_spill]]  ;;  %s2261_s11 = sld [smem:[#allocation23_spill]] }
 0x13c   : > { %s2262_s21 = smov %s1537_s22  ;;  %s2263_s22 = smov %s1541_s23 }
 0x13d   : > { %s2264_s23 = smov %s1850_s19  ;;  %s2265_s24 = smov %s1549_s25 }
 0x13e   : > { %s2267_s27 = smov %s1565_s29  ;;  %s2268_s28 = smov %s1569_s30 }
 0x13f   : > { %s2266_s25 = smov %s2258_s9  ;;  %27 = sbr.rel (!%p25_p5) target bundleno = 19 (0x13), region = 156 }
 0x141   : > { %s2269_s29 = smov %s2260_s4  ;;  %s2270_s30 = smov %s2261_s11 }
 0x146   :  { %911 = vsyncpa [#allocation4], 1 }
 0x147   :  { %913 = vsyncpa [#allocation4 + $0x1], 1 }
 0x148   :  { %914 = vsyncpa [#allocation7], 1 }
 0x149   :  { %916 = vsyncpa [#allocation7 + $0x1], 1 }
 0x14a   :  { %917 = vsyncpa [#allocation10], 1 }
 0x14b   :  { %919 = vsyncpa [#allocation10 + $0x1], 1 }
 0x14c   :  { %920 = vsyncpa [#allocation5], 1 }
 0x14d   :  { %922 = vsyncpa [#allocation5 + $0x1], 1 }

</bundles_post_ra>
